<compile_context>
chip_gen: v7x
topology: tpu7x:2x2x1
jax: 0.10.0
libtpu: 0.0.40
codegen_flags: <defaults>
</compile_context>

<pallas_src>
import functools

import jax
import jax.numpy as jnp
from jax.experimental import pallas as pl
from jax.experimental.pallas import tpu as pltpu


def _round_up(a, m):
    return ((a + m - 1) // m) * m


def _tile_defaults():
    """Generation-aware (tm, th, vmem_limit, want_multi_row_tiles)."""
    try:
        kind = jax.devices()[0].device_kind.lower()
    except Exception:  # pragma: no cover - defensive
        kind = ""
    if "v7" in kind or "7x" in kind:
        # Half the VMEM of v5e/v6e but ~2.3x HBM BW: tm=512 already hits the
        # compute roofline; keep double-buffered VMEM <= ~48 MiB. 2 TCs/chip
        # => make sure there are at least 2 row tiles.
        return 512, 512, 48 << 20, True
    if "v6" in kind:
        return 1024, 512, 80 << 20, False
    if "v5" in kind:
        return 512, 512, 80 << 20, False
    return 512, 512, 64 << 20, False


def mlp_kernel(x_ref, w1_ref, b1_ref, w2_ref, b2_ref, o_ref, acc_ref):
    """One (row-tile x hidden-tile) step of fc1 -> ReLU -> fc2."""
    h_idx = pl.program_id(1)

    @pl.when(h_idx == 0)
    def _():
        # Start the accumulator at the fc2 bias: removes one (tm, O_p) f32
        # VPU pass from the serial epilogue of every row tile.
        acc_ref[...] = jnp.broadcast_to(b2_ref[...], acc_ref.shape)

    # fc1 partial: x @ W1[:, h_tile] + b1[h_tile]   (bf16 operands, f32 acc)
    h = jnp.dot(x_ref[...], w1_ref[...], preferred_element_type=jnp.float32)
    h = jnp.maximum(h + b1_ref[...], 0.0)          # bias + ReLU
    # drop1: p = 0.0 -> identity

    # fc2 partial: relu(h) @ W2[h_tile, :], accumulated in f32
    acc_ref[...] += jnp.dot(h.astype(w2_ref.dtype), w2_ref[...],
                            preferred_element_type=jnp.float32)

    @pl.when(h_idx == pl.num_programs(1) - 1)
    def _():
        # drop2: p = 0.0 -> identity
        o_ref[...] = acc_ref[...].astype(o_ref.dtype)


def prepare_mlp_params(w1, b1, w2, b2, *, th=512, compute_dtype=jnp.bfloat16):
    """One-time weight preparation (pad + cast), hoisted out of the hot path.

    w1: [C, H] (= fc1.weight.T), b1: [H], w2: [H, O] (= fc2.weight.T), b2: [O].
    Padding with zeros is exact: padded input cols hit zero weight rows,
    padded hidden units get bias 0 -> ReLU 0 -> contribute nothing, padded
    output cols are sliced away by the caller.
    NOTE(v7x): for very large C/O (>= 8192) pass th=256 to halve the per-step
    W1/W2 tiles and keep room for a large row tile in the 64 MiB VMEM.
    """
    C, H = w1.shape
    H2, O = w2.shape
    assert H == H2 and b1.size == H and b2.size == O

    C_p = _round_up(C, 128)
    O_p = _round_up(O, 128)
    th = max(128, min(th, _round_up(H, 128)))
    H_p = _round_up(H, th)

    if (C_p, H_p) == (C, H) and w1.dtype == compute_dtype:
        w1p = w1
    else:
        w1p = jnp.zeros((C_p, H_p), compute_dtype).at[:C, :H].set(
            w1.astype(compute_dtype))
    if (H_p, O_p) == (H, O) and w2.dtype == compute_dtype:
        w2p = w2
    else:
        w2p = jnp.zeros((H_p, O_p), compute_dtype).at[:H, :O].set(
            w2.astype(compute_dtype))

    b1p = jnp.zeros((1, H_p), jnp.float32).at[:, :H].set(
        b1.reshape(1, H).astype(jnp.float32))
    b2p = jnp.zeros((1, O_p), jnp.float32).at[:, :O].set(
        b2.reshape(1, O).astype(jnp.float32))

    return dict(w1=w1p, b1=b1p, w2=w2p, b2=b2p,
                dims=(C, H, O), th=th, compute_dtype=compute_dtype)


def mlp_pallas(x2d, params, *, tm=None, vmem_limit_bytes=None):
    """x2d: [M, C] tokens; params from prepare_mlp_params(). Returns [M, O]."""
    M, C = x2d.shape
    C_true, H, O = params["dims"]
    assert C == C_true
    th = params["th"]
    compute_dtype = params["compute_dtype"]
    w1p, b1p, w2p, b2p = params["w1"], params["b1"], params["w2"], params["b2"]
    C_p, H_p = w1p.shape
    O_p = w2p.shape[1]
    out_dtype = x2d.dtype
    out_bytes = jnp.dtype(out_dtype).itemsize
    cmp_bytes = jnp.dtype(compute_dtype).itemsize

    tm_default, _, vmem_budget, want_multi = _tile_defaults()
    if tm is None:
        tm = tm_default
    if vmem_limit_bytes is None:
        vmem_limit_bytes = vmem_budget

    # Row tile: multiple of 8, clamped so we don't over-pad tiny inputs.
    tm = max(8, min(tm, _round_up(M, 8)))

    # v7x: ensure the parallel row axis feeds both TensorCores when possible.
    if want_multi:
        while tm > 8 and _round_up(M, tm) // tm < 2:
            tm = max(8, _round_up(tm // 2, 8))

    # VMEM-budget guard: double-buffered in/out tiles + f32 accumulator.
    def _resident(tm_):
        return (2 * tm_ * C_p * cmp_bytes          # x tile (double-buffered)
                + 2 * C_p * th * cmp_bytes         # W1 tile
                + 2 * th * O_p * cmp_bytes         # W2 tile
                + 2 * tm_ * O_p * out_bytes        # out tile
                + tm_ * O_p * 4                    # f32 accumulator
                + 2 * (H_p + O_p) * 4)             # biases
    while tm > 8 and _resident(tm) > vmem_limit_bytes:
        tm = max(8, _round_up(tm // 2, 8))

    M_p = _round_up(M, tm)

    # Activation pad/cast: skip entirely when already aligned (common case).
    if M_p == M and C_p == C:
        xp = x2d if x2d.dtype == compute_dtype else x2d.astype(compute_dtype)
    else:
        xp = jnp.zeros((M_p, C_p), compute_dtype).at[:M, :C].set(
            x2d.astype(compute_dtype))

    grid = (M_p // tm, H_p // th)   # rows parallel, hidden reduction last

    cost = pl.CostEstimate(
        flops=2 * M * (C * H + H * O),
        transcendentals=0,
        bytes_accessed=(M * C * cmp_bytes + C * H * cmp_bytes
                        + H * O * cmp_bytes + M * O * out_bytes),
    )

    out = pl.pallas_call(
        mlp_kernel,
        out_shape=jax.ShapeDtypeStruct((M_p, O_p), out_dtype),
        grid_spec=pltpu.PrefetchScalarGridSpec(
            num_scalar_prefetch=0,
            grid=grid,
            in_specs=[
                pl.BlockSpec((tm, C_p), lambda i, h: (i, 0)),   # x row tile
                pl.BlockSpec((C_p, th), lambda i, h: (0, h)),   # W1 hidden tile
                pl.BlockSpec((1, th),   lambda i, h: (0, h)),   # b1 hidden tile
                pl.BlockSpec((th, O_p), lambda i, h: (h, 0)),   # W2 hidden tile
                pl.BlockSpec((1, O_p),  lambda i, h: (0, 0)),   # b2 (invariant)
            ],
            out_specs=pl.BlockSpec((tm, O_p), lambda i, h: (i, 0)),
            scratch_shapes=[pltpu.VMEM((tm, O_p), jnp.float32)],
        ),
        compiler_params=pltpu.CompilerParams(
            dimension_semantics=("parallel", "arbitrary"),
            vmem_limit_bytes=vmem_limit_bytes),
        cost_estimate=cost,
    )(xp, w1p, b1p, w2p, b2p)

    return out[:M, :O]


def mlp_reference(x2d, w1, b1, w2, b2):
    h = jnp.maximum(x2d @ w1 + b1.reshape(1, -1), 0.0)
    return h @ w2 + b2.reshape(1, -1)


if __name__ == "__main__":
    # Small shapes consistent with the module's forward: a batch of token
    # vectors through two Linear layers with ReLU in between.
    B, S = 2, 8
    in_features = 32
    hidden_features = 64
    out_features = 32

    key = jax.random.PRNGKey(0)
    kx, kw1, kb1, kw2, kb2 = jax.random.split(key, 5)

    x = jax.random.normal(kx, (B, S, in_features), dtype=jnp.float32)

    # PyTorch nn.Linear param shapes: fc1.weight [H, C], fc1.bias [H];
    # fc2.weight [O, H], fc2.bias [O].  Pre-transpose the weights.
    fc1_w = jax.random.normal(kw1, (hidden_features, in_features), jnp.float32) * 0.05
    fc1_b = jax.random.normal(kb1, (hidden_features,), jnp.float32) * 0.05
    fc2_w = jax.random.normal(kw2, (out_features, hidden_features), jnp.float32) * 0.05
    fc2_b = jax.random.normal(kb2, (out_features,), jnp.float32) * 0.05

    w1 = fc1_w.T                      # [C, H]
    w2 = fc2_w.T                      # [H, O]

    x2d = x.reshape(B * S, in_features)

    # One-time weight preparation (pad + bf16 cast) outside the hot path.
    params = prepare_mlp_params(w1, fc1_b, w2, fc2_b)

    out2d = mlp_pallas(x2d, params)
    out2d = jax.block_until_ready(out2d)
    out = out2d.reshape(B, S, out_features)

    ref = mlp_reference(x2d, w1, fc1_b, w2, fc2_b).reshape(B, S, out_features)
    assert out.shape == (B, S, out_features)
    # bf16 MXU operands with f32 accumulation => relaxed tolerance vs f32 ref.
    assert jnp.allclose(out, ref, atol=2e-2, rtol=2e-2), "mismatch vs reference"

    print("KERNEL_OK")
</pallas_src>

<mosaic_0001>
module attributes {stable_mosaic.version = 11 : i64} {
  func.func @mlp_kernel(%arg0: i32, %arg1: i32, %arg2: memref<16x128xbf16, #tpu.memory_space<vmem>>, %arg3: memref<128x128xbf16, #tpu.memory_space<vmem>>, %arg4: memref<1x128xf32, #tpu.memory_space<vmem>>, %arg5: memref<128x128xbf16, #tpu.memory_space<vmem>>, %arg6: memref<1x128xf32, #tpu.memory_space<vmem>>, %arg7: memref<16x128xf32, #tpu.memory_space<vmem>>, %arg8: memref<16x128xf32, #tpu.memory_space<vmem>>) attributes {dimension_semantics = [#tpu.dimension_semantics<parallel>, #tpu.dimension_semantics<arbitrary>], iteration_bounds = array<i64: 1, 1>, scalar_prefetch = 0 : i64, scratch_operands = 1 : i64, tpu.core_type = #tpu.core_type<tc>, window_params = [{transform_indices = @transform_0, window_bounds = array<i64: 16, 128>}, {transform_indices = @transform_1, window_bounds = array<i64: 128, 128>}, {transform_indices = @transform_2, window_bounds = array<i64: 1, 128>}, {transform_indices = @transform_3, window_bounds = array<i64: 128, 128>}, {pipeline_mode = #tpu.pipeline_mode<synchronous>, transform_indices = @transform_4, window_bounds = array<i64: 1, 128>}, {transform_indices = @transform_5, window_bounds = array<i64: 16, 128>}]} {
    %c0_i32 = arith.constant 0 : i32
    %0 = arith.cmpi eq, %arg1, %c0_i32 : i32
    %1 = arith.extui %0 : i1 to i32
    %c0_i32_0 = arith.constant 0 : i32
    %2 = arith.cmpi ne, %1, %c0_i32_0 : i32
    scf.if %2 {
      %c0_16 = arith.constant 0 : index
      %c0_17 = arith.constant 0 : index
      %20 = vector.load %arg6[%c0_16, %c0_17] : memref<1x128xf32, #tpu.memory_space<vmem>>, vector<1x128xf32>
      %21 = vector.shape_cast %20 : vector<1x128xf32> to vector<1x128xf32>
      %22 = vector.broadcast %21 : vector<1x128xf32> to vector<16x128xf32>
      %c0_18 = arith.constant 0 : index
      %c0_19 = arith.constant 0 : index
      %23 = vector.load %arg8[%c0_18, %c0_19] : memref<16x128xf32, #tpu.memory_space<vmem>>, vector<16x128xf32>
      tpu.vector_store %arg8[%c0_18, %c0_19], %22 {strides = array<i32>} : memref<16x128xf32, #tpu.memory_space<vmem>>, vector<16x128xf32>,
    } else {
    }
    %c0 = arith.constant 0 : index
    %c0_1 = arith.constant 0 : index
    %3 = vector.load %arg2[%c0, %c0_1] : memref<16x128xbf16, #tpu.memory_space<vmem>>, vector<16x128xbf16>
    %c0_2 = arith.constant 0 : index
    %c0_3 = arith.constant 0 : index
    %4 = vector.load %arg3[%c0_2, %c0_3] : memref<128x128xbf16, #tpu.memory_space<vmem>>, vector<128x128xbf16>
    %cst = arith.constant dense<0.000000e+00> : vector<16x128xf32>
    %5 = tpu.matmul %3, %4, %cst {dimension_numbers = #tpu.dot_dimension_numbers<[1], [0], [0], [1], [0, 0, 1, 1], [], []>} : vector<16x128xbf16>, vector<128x128xbf16>, vector<16x128xf32> -> vector<16x128xf32>
    %c0_4 = arith.constant 0 : index
    %c0_5 = arith.constant 0 : index
    %6 = vector.load %arg4[%c0_4, %c0_5] : memref<1x128xf32, #tpu.memory_space<vmem>>, vector<1x128xf32>
    %7 = vector.broadcast %6 : vector<1x128xf32> to vector<16x128xf32>
    %8 = arith.addf %5, %7 : vector<16x128xf32>
    %cst_6 = arith.constant 0.000000e+00 : f32
    %9 = vector.broadcast %cst_6 : f32 to vector<16x128xf32>
    %10 = arith.maximumf %8, %9 : vector<16x128xf32>
    %c0_7 = arith.constant 0 : index
    %c0_8 = arith.constant 0 : index
    %11 = vector.load %arg8[%c0_7, %c0_8] : memref<16x128xf32, #tpu.memory_space<vmem>>, vector<16x128xf32>
    %12 = arith.truncf %10 : vector<16x128xf32> to vector<16x128xbf16>
    %c0_9 = arith.constant 0 : index
    %c0_10 = arith.constant 0 : index
    %13 = vector.load %arg5[%c0_9, %c0_10] : memref<128x128xbf16, #tpu.memory_space<vmem>>, vector<128x128xbf16>
    %cst_11 = arith.constant dense<0.000000e+00> : vector<16x128xf32>
    %14 = tpu.matmul %12, %13, %cst_11 {dimension_numbers = #tpu.dot_dimension_numbers<[1], [0], [0], [1], [0, 0, 1, 1], [], []>} : vector<16x128xbf16>, vector<128x128xbf16>, vector<16x128xf32> -> vector<16x128xf32>
    %15 = arith.addf %11, %14 : vector<16x128xf32>
    %c0_12 = arith.constant 0 : index
    %c0_13 = arith.constant 0 : index
    %16 = vector.load %arg8[%c0_12, %c0_13] : memref<16x128xf32, #tpu.memory_space<vmem>>, vector<16x128xf32>
    tpu.vector_store %arg8[%c0_12, %c0_13], %15 {strides = array<i32>} : memref<16x128xf32, #tpu.memory_space<vmem>>, vector<16x128xf32>,
    %c0_i32_14 = arith.constant 0 : i32
    %17 = arith.cmpi eq, %arg1, %c0_i32_14 : i32
    %18 = arith.extui %17 : i1 to i32
    %c0_i32_15 = arith.constant 0 : i32
    %19 = arith.cmpi ne, %18, %c0_i32_15 : i32
    scf.if %19 {
      %c0_16 = arith.constant 0 : index
      %c0_17 = arith.constant 0 : index
      %20 = vector.load %arg8[%c0_16, %c0_17] : memref<16x128xf32, #tpu.memory_space<vmem>>, vector<16x128xf32>
      %c0_18 = arith.constant 0 : index
      %c0_19 = arith.constant 0 : index
      %21 = vector.load %arg7[%c0_18, %c0_19] : memref<16x128xf32, #tpu.memory_space<vmem>>, vector<16x128xf32>
      tpu.vector_store %arg7[%c0_18, %c0_19], %20 {strides = array<i32>} : memref<16x128xf32, #tpu.memory_space<vmem>>, vector<16x128xf32>,
    } else {
    }
    return
  }
  func.func @transform_0(%arg0: i32, %arg1: i32) -> (i32, i32) {
    %c0_i32 = arith.constant 0 : i32
    %c0_i32_0 = arith.constant 0 : i32
    return %arg0, %c0_i32 : i32, i32
  }
  func.func @transform_1(%arg0: i32, %arg1: i32) -> (i32, i32) {
    %c0_i32 = arith.constant 0 : i32
    %c0_i32_0 = arith.constant 0 : i32
    return %c0_i32, %arg1 : i32, i32
  }
  func.func @transform_2(%arg0: i32, %arg1: i32) -> (i32, i32) {
    %c0_i32 = arith.constant 0 : i32
    %c0_i32_0 = arith.constant 0 : i32
    return %c0_i32, %arg1 : i32, i32
  }
  func.func @transform_3(%arg0: i32, %arg1: i32) -> (i32, i32) {
    %c0_i32 = arith.constant 0 : i32
    %c0_i32_0 = arith.constant 0 : i32
    return %arg1, %c0_i32 : i32, i32
  }
  func.func @transform_4(%arg0: i32, %arg1: i32) -> (i32, i32) {
    %c0_i32 = arith.constant 0 : i32
    %c0_i32_0 = arith.constant 0 : i32
    %c0_i32_1 = arith.constant 0 : i32
    return %c0_i32, %c0_i32_0 : i32, i32
  }
  func.func @transform_5(%arg0: i32, %arg1: i32) -> (i32, i32) {
    %c0_i32 = arith.constant 0 : i32
    %c0_i32_0 = arith.constant 0 : i32
    return %arg0, %c0_i32 : i32, i32
  }
}

</mosaic_0001>

<bundles_post_ra>
// kernel: tpu_custom_call.1
= control target key start
LH: loop header
LB: loop body
LE: loop exit
PB: predicated region body
PF: predicated region fallthrough
CT: control target
= control target key end

     0   :  { %10 = vsyncpa [#allocation4], 0  ;;  %s735_s0 = inlined_call_operand.hbm [shape: bf16[16,128], index: 0, kind: input, shape index: {}]   ;;  %s736_s1 = inlined_call_operand.hbm [shape: bf16[128,128], index: 1, kind: input, shape index: {}]   ;;  %s737_s2 = inlined_call_operand.hbm [shape: f32[1,128], index: 2, kind: input, shape index: {}]   ;;  %s738_s3 = inlined_call_operand.hbm [shape: bf16[128,128], index: 3, kind: input, shape index: {}]   ;;  %s739_s4 = inlined_call_operand.hbm [shape: f32[1,128], index: 4, kind: input, shape index: {}]   ;;  %s740_s5 = inlined_call_operand.hbm [shape: f32[16,128], index: 5, kind: output, shape index: {}]  }
   0x1   :  { %11 = vsyncpa [#allocation7], 0 }
   0x2   :  { %12 = vsyncpa [#allocation10], 0 }
   0x3   :  { %13 = vsyncpa [#allocation5], 0  ;;  %s605_s18 = smov [#allocation6]   ;;  %s606_s20 = smov [#allocation9]  }
   0x4   :  { %s31_s19 = sshll.u32 %s605_s18, 4  ;;  %s53_s21 = sshll.u32 %s606_s20, 4  ;;  %s32_s19 = int_to_ptr.vmem [resolvable:$true] %s31_s19  ;;  %s647_s21 = int_to_ptr.vmem [resolvable:$true] %s53_s21 }
   0x5   :  { %s465_s24 = scalar_lea.hbm %s736_s1, 1024 }
   0x6   :  { %p466_p0 = scmp.ne.s32.totalorder %s736_s1, %s465_s24  ;;  %p469_p1 = scmp.lt.u32.totalorder %s465_s24, %s736_s1 }
   0x8   :  { %p471_p2 = pnand %p469_p1, %p466_p0 }
   0xa   :  { %474 = shalt.err (!%p471_p2)
}
   0xb   :  { %s475_s29 = scalar_lea.vmem %s32_s19, 1024  ;;  %p480_p4 = scmp.lt.s32.totalorder %s32_s19, %s32_s19 }
   0xc   :  { %p476_p3 = scmp.ne.s32.totalorder %s32_s19, %s475_s29  ;;  %p481_p5 = scmp.lt.s32.totalorder %s475_s29, %s475_s29 }
   0xe   :  { %p482_p6 = por %p481_p5, %p480_p4 }
  0x10   :  { %p483_p7 = pnand %p482_p6, %p476_p3 }
  0x12   :  { %486 = shalt.err (!%p483_p7)
}
  0x13   :  { %s607_s30 = smov 64   ;;  %s608_s6 = smov 4  }
  0x14   :  { %37 = dma.hbm_to_vmem [thread:$0]  %s736_s1, 1024, %s32_s19, [#allocation7], %s607_s30, %s607_s30, %s608_s6  }
  0x15   :  { %s487_s11 = scalar_lea.hbm %s738_s3, 1024 }
  0x16   :  { %p488_p8 = scmp.ne.s32.totalorder %s738_s3, %s487_s11  ;;  %p491_p9 = scmp.lt.u32.totalorder %s487_s11, %s738_s3 }
  0x18   :  { %p493_p10 = pnand %p491_p9, %p488_p8 }
  0x1a   :  { %496 = shalt.err (!%p493_p10)
}
  0x1b   :  { %s497_s16 = scalar_lea.vmem %s647_s21, 1024  ;;  %p502_p12 = scmp.lt.s32.totalorder %s647_s21, %s647_s21 }
  0x1c   :  { %p498_p11 = scmp.ne.s32.totalorder %s647_s21, %s497_s16  ;;  %p503_p13 = scmp.lt.s32.totalorder %s497_s16, %s497_s16 }
  0x1e   :  { %p504_p0 = por %p503_p13, %p502_p12 }
  0x20   :  { %p505_p1 = pnand %p504_p0, %p498_p11 }
  0x22   :  { %508 = shalt.err (!%p505_p1)
}
  0x23   :  { %59 = dma.hbm_to_vmem [thread:$0]  %s738_s3, 1024, %s647_s21, [#allocation10], %s607_s30, %s607_s30, %s608_s6  }
  0x24   :  { %s609_s18 = smov [#allocation3]   ;;  %s610_s20 = smov [#allocation8]  }
  0x25   :  { %s19_s19 = sshll.u32 %s609_s18, 4  ;;  %s44_s22 = sshll.u32 %s610_s20, 4  ;;  %s20_s19 = int_to_ptr.vmem [resolvable:$true] %s19_s19  ;;  %s45_s22 = int_to_ptr.vmem [resolvable:$true] %s44_s22 }
  0x26   :  { %s509_s25 = scalar_lea.hbm %s735_s0, 128 }
  0x27   :  { %p510_p2 = scmp.ne.s32.totalorder %s735_s0, %s509_s25  ;;  %p513_p3 = scmp.lt.u32.totalorder %s509_s25, %s735_s0 }
  0x29   :  { %p515_p4 = pnand %p513_p3, %p510_p2 }
  0x2b   :  { %518 = shalt.err (!%p515_p4)
}
  0x2c   :  { %s519_s3 = scalar_lea.vmem %s20_s19, 128  ;;  %p524_p6 = scmp.lt.s32.totalorder %s20_s19, %s20_s19 }
  0x2d   :  { %p520_p5 = scmp.ne.s32.totalorder %s20_s19, %s519_s3  ;;  %p525_p7 = scmp.lt.s32.totalorder %s519_s3, %s519_s3 }
  0x2f   :  { %p526_p8 = por %p525_p7, %p524_p6 }
  0x31   :  { %p527_p9 = pnand %p526_p8, %p520_p5 }
  0x33   :  { %530 = shalt.err (!%p527_p9)
}
  0x34   :  { %25 = dma.hbm_to_vmem [thread:$0]  %s735_s0, 128, %s20_s19, [#allocation4], %s607_s30, %s607_s30, %s608_s6  }
  0x35   :  { %s531_s10 = scalar_lea.hbm %s737_s2, 16 }
  0x36   :  { %p532_p10 = scmp.ne.s32.totalorder %s737_s2, %s531_s10  ;;  %p535_p11 = scmp.lt.u32.totalorder %s531_s10, %s737_s2 }
  0x38   :  { %p537_p12 = pnand %p535_p11, %p532_p10 }
  0x3a   :  { %540 = shalt.err (!%p537_p12)
}
  0x3b   :  { %s541_s15 = scalar_lea.vmem %s45_s22, 16  ;;  %s545_s16 = scalar_lea.vmem %s45_s22, 32 }
  0x3c   :  { %p542_p13 = scmp.ne.s32.totalorder %s45_s22, %s541_s15  ;;  %p546_p0 = scmp.lt.s32.totalorder %s45_s22, %s45_s22 }
  0x3d   :  { %p547_p1 = scmp.lt.s32.totalorder %s545_s16, %s541_s15 }
  0x3f   :  { %p548_p2 = por %p547_p1, %p546_p0 }
  0x41   :  { %p549_p3 = pnand %p548_p2, %p542_p13 }
  0x43   :  { %552 = shalt.err (!%p549_p3)
}
  0x44   :  { %47 = dma.hbm_to_vmem [thread:$0]  %s737_s2, 16, %s45_s22, [#allocation7]  }
  0x45   :  { %s611_s6 = smov [#allocation11]   ;;  %s553_s19 = scalar_lea.hbm %s739_s4, 16 }
  0x46   :  { %s66_s1 = sshll.u32 %s611_s6, 4  ;;  %p554_p4 = scmp.ne.s32.totalorder %s739_s4, %s553_s19  ;;  %s67_s1 = int_to_ptr.vmem [resolvable:$true] %s66_s1 }
  0x47   :  { %p557_p5 = scmp.lt.u32.totalorder %s553_s19, %s739_s4 }
  0x49   :  { %p559_p6 = pnand %p557_p5, %p554_p4 }
  0x4b   :  { %562 = shalt.err (!%p559_p6)
}
  0x4c   :  { %s563_s26 = scalar_lea.vmem %s67_s1, 16  ;;  %s567_s2 = scalar_lea.vmem %s67_s1, 32 }
  0x4d   :  { %p564_p7 = scmp.ne.s32.totalorder %s67_s1, %s563_s26  ;;  %p568_p8 = scmp.lt.s32.totalorder %s67_s1, %s67_s1 }
  0x4e   :  { %p569_p9 = scmp.lt.s32.totalorder %s567_s2, %s563_s26 }
  0x50   :  { %p570_p10 = por %p569_p9, %p568_p8 }
  0x52   :  { %p571_p11 = pnand %p570_p10, %p564_p7 }
  0x54   :  { %574 = shalt.err (!%p571_p11)
}
  0x55   :  { %69 = dma.hbm_to_vmem [thread:$0]  %s739_s4, 16, %s67_s1, [#allocation10]  }
  0x56   :  { %597 = dma.done.wait [#allocation4], 128  }
  0x57   :  { %598 = vsyncadd [#allocation4], 4294967168 }
  0x58   :  { %599 = dma.done.wait [#allocation7], 1040  }
  0x59   :  { %600 = vsyncadd [#allocation7], 4294966256 }
  0x5a   :  { %601 = dma.done.wait [#allocation10], 1040  }
  0x5b   :  { %602 = vsyncadd [#allocation10], 4294966256  ;;  %v612_v0 = vmov 0.0   ;;  %vm613_vm0 = vmmov 0   ;;  %v448_v1 = vld [vmem:[#allocation6] sm:$0xff]   ;;  %v449_v2 = vld [vmem:[#allocation6 + $0x8] sm:$0xff]  }
  0x5c   :  { %396 = vmatprep.subr.bf16.mxu0 %v612_v0  ;;  %412 = vmatprep.mubr.msk.bf16.mxu0 %vm613_vm0, %v612_v0  ;;  %v450_v3 = vld [vmem:[#allocation6 + $0x10] sm:$0xff]   ;;  %v457_v4 = vld [vmem:[#allocation9] sm:$0xff]   ;;  %v451_v5 = vld [vmem:[#allocation6 + $0x18] sm:$0xff]   ;;  %s614_s4 = smov [#allocation12]  }
  0x5d   :  { %416 = vmatprep.subr.bf16.mxu1 %v612_v0  ;;  %432 = vmatprep.mubr.msk.bf16.mxu1 %vm613_vm0, %v612_v0  ;;  %v458_v6 = vld [vmem:[#allocation9 + $0x8] sm:$0xff]   ;;  %v452_v7 = vld [vmem:[#allocation6 + $0x20] sm:$0xff]   ;;  %v459_v8 = vld [vmem:[#allocation9 + $0x10] sm:$0xff]   ;;  %s345_s28 = sshll.u32 %s614_s4, 4  ;;  %s346_s28 = int_to_ptr.vmem [resolvable:$true] %s345_s28 }
  0x5e   :  { %397 = vmatpush3.bf16.msra.mxu0 %v448_v1  ;;  %417 = vmatpush3.bf16.msra.mxu1 %v457_v4  ;;  %v453_v9 = vld [vmem:[#allocation6 + $0x28] sm:$0xff]   ;;  %v460_v10 = vld [vmem:[#allocation9 + $0x18] sm:$0xff]   ;;  %v454_v11 = vld [vmem:[#allocation6 + $0x30] sm:$0xff]   ;;  %s575_s29 = scalar_lea.vmem %s346_s28, 256  ;;  %p580_p13 = scmp.lt.s32.totalorder %s346_s28, %s346_s28 }
  0x5f   :  { %398 = vmatprep.subr.bf16.mxu0 %v612_v0  ;;  %418 = vmatprep.subr.bf16.mxu1 %v612_v0  ;;  %v461_v12 = vld [vmem:[#allocation9 + $0x20] sm:$0xff]   ;;  %v455_v13 = vld [vmem:[#allocation6 + $0x38] sm:$0xff]   ;;  %v462_v14 = vld [vmem:[#allocation9 + $0x28] sm:$0xff]   ;;  %p576_p12 = scmp.ne.s32.totalorder %s346_s28, %s575_s29  ;;  %p581_p0 = scmp.lt.s32.totalorder %s575_s29, %s575_s29 }
  0x60   :  { %v456_v15 = vld [vmem:[#allocation3] sm:$0xff]   ;;  %v360_v18 = vld [vmem:[#allocation8] ss:$0 sm:$0xff]  ;;  %v359_v28 = vld [vmem:[#allocation11] ss:$0 sm:$0xff] }
  0x61   :  { %v463_v16 = vld [vmem:[#allocation9 + $0x30] sm:$0xff]   ;;  %v464_v17 = vld [vmem:[#allocation9 + $0x38] sm:$0xff]   ;;  %p582_p1 = por %p581_p0, %p580_p13 }
  0x62   :  { %399 = vmatpush3.bf16.msra.mxu0 %v449_v2  ;;  %419 = vmatpush3.bf16.msra.mxu1 %v458_v6 }
  0x63   :  { %400 = vmatprep.subr.bf16.mxu0 %v612_v0  ;;  %420 = vmatprep.subr.bf16.mxu1 %v612_v0  ;;  %p583_p2 = pnand %p582_p1, %p576_p12 }
  0x66   :  { %401 = vmatpush3.bf16.msra.mxu0 %v450_v3  ;;  %421 = vmatpush3.bf16.msra.mxu1 %v459_v8 }
  0x67   :  { %402 = vmatprep.subr.bf16.mxu0 %v612_v0  ;;  %422 = vmatprep.subr.bf16.mxu1 %v612_v0 }
  0x6a   :  { %403 = vmatpush3.bf16.msra.mxu0 %v451_v5  ;;  %423 = vmatpush3.bf16.msra.mxu1 %v460_v10 }
  0x6b   :  { %404 = vmatprep.subr.bf16.mxu0 %v612_v0  ;;  %424 = vmatprep.subr.bf16.mxu1 %v612_v0 }
  0x6e   :  { %405 = vmatpush3.bf16.msra.mxu0 %v452_v7  ;;  %425 = vmatpush3.bf16.msra.mxu1 %v461_v12 }
  0x6f   :  { %406 = vmatprep.subr.bf16.mxu0 %v612_v0  ;;  %426 = vmatprep.subr.bf16.mxu1 %v612_v0 }
  0x72   :  { %407 = vmatpush3.bf16.msra.mxu0 %v453_v9  ;;  %427 = vmatpush3.bf16.msra.mxu1 %v462_v14 }
  0x73   :  { %408 = vmatprep.subr.bf16.mxu0 %v612_v0  ;;  %428 = vmatprep.subr.bf16.mxu1 %v612_v0 }
  0x76   :  { %409 = vmatpush3.bf16.msra.mxu0 %v454_v11  ;;  %429 = vmatpush3.bf16.msra.mxu1 %v463_v16 }
  0x77   :  { %410 = vmatprep.subr.bf16.mxu0 %v612_v0  ;;  %430 = vmatprep.subr.bf16.mxu1 %v612_v0 }
  0x7a   :  { %411 = vmatpush3.bf16.msra.mxu0 %v455_v13  ;;  %431 = vmatpush3.bf16.msra.mxu1 %v464_v17 }
  0x7d   :  { %413 = vmatmul.mubr.bf16.vlgmr.msra.gmra.mrb[0].mxu0 %v456_v15 }
 0x150   :  { %v212_v19 = vpop.f32.mrb[0].mxu0 }
 0x151   :  { %v213_v20 = vadd.f32 %v360_v18, %v212_v19  ;;  %v414_v21 = vpop.f32.mrb[1].mxu0 }
 0x152   :  { %v215_v22 = vpop.f32.mrb[2].mxu0 }
 0x153   :  { %v216_v23 = vadd.f32 %v360_v18, %v215_v22  ;;  %v415_v24 = vpop.f32.mrb[3].mxu0  ;;  %v219_v25 = vmax.f32 %v213_v20, 0.0 }
 0x155   :  { %v220_v26 = vmax.f32 %v216_v23, 0.0 }
 0x157   :  { %v223_v27 = vpack.c.bf16 %v220_v26, %v219_v25 }
 0x159   :  { %433 = vmatmul.mubr.bf16.vlgmr.msra.gmra.mrb[0].mxu1 %v223_v27 }
 0x22c   :  { %v322_v29 = vpop.f32.mrb[0].mxu1 }
 0x22d   :  { %v329_v30 = vadd.f32 %v359_v28, %v322_v29  ;;  %v434_v31 = vpop.f32.mrb[1].mxu1 }
 0x22e   :  { %v325_v32 = vpop.f32.mrb[2].mxu1 }
 0x22f   :  { %338 = vst [vmem:[#allocation12] sm:$0xff] %v329_v30  ;;  %v330_v33 = vadd.f32 %v359_v28, %v325_v32  ;;  %v435_v34 = vpop.f32.mrb[3].mxu1 }
 0x231   :  { %339 = vst [vmem:[#allocation12 + $0x8] sm:$0xff] %v330_v33 }
 0x232   :  { %586 = shalt.err (!%p583_p2)
}
 0x233   :  { %s587_s7 = scalar_lea.hbm %s740_s5, 256 }
 0x234   :  { %p588_p3 = scmp.ne.s32.totalorder %s740_s5, %s587_s7  ;;  %p591_p4 = scmp.lt.u32.totalorder %s587_s7, %s740_s5 }
 0x236   :  { %p593_p5 = pnand %p591_p4, %p588_p3 }
 0x238   :  { %596 = shalt.err (!%p593_p5)
}
 0x239   :  { %s615_s12 = smov 128   ;;  %s616_s13 = smov 8  }
 0x23a   :  { %351 = dma.vmem_to_hbm [thread:$0]  %s346_s28, 256, %s740_s5, [#allocation5], %s615_s12, %s615_s12, %s616_s13  }
 0x23b   :  { %603 = dma.done.wait [#allocation5], 256  }
 0x23c   :  { %604 = vsyncadd [#allocation5], 4294967040 }
 0x23d   :  { %355 = vsyncpa [#allocation4], 1 }
 0x23e   :  { %356 = vsyncpa [#allocation7], 1 }
 0x23f   :  { %357 = vsyncpa [#allocation10], 1 }
 0x240   :  { %358 = vsyncpa [#allocation5], 1 }

</bundles_post_ra>
